<compile_context>
chip_gen: v5e
topology: v5e:2x2
jax: 0.10.0
libtpu: 0.0.40
codegen_flags: <defaults>
</compile_context>

<pallas_src>
import functools
import math

import jax
import jax.numpy as jnp
from jax import lax
from jax.experimental import pallas as pl
from jax.experimental.pallas import tpu as pltpu


# 48 MiB scoped VMEM: > v5e/v6e defaults, leaves headroom under v7x's 64 MiB.
VMEM_LIMIT = 48 * 1024 * 1024


# ----------------------------- tiling helper -----------------------------

def _tile(dim, target, align):
    """Largest multiple of `align` <= target that divides dim, else full dim."""
    if dim <= target:
        return dim
    t = (target // align) * align
    while t >= align:
        if dim % t == 0:
            return t
        t -= align
    return dim


# ----------------------------- linear (tiled M/N/K) -----------------------------

def _linear_kernel(x_ref, w_ref, b_ref, o_ref, acc_ref, *, activation):
    k = pl.program_id(2)

    @pl.when(k == 0)
    def _():
        acc_ref[...] = jnp.zeros_like(acc_ref)

    acc_ref[...] += jnp.dot(x_ref[...].astype(jnp.bfloat16),
                            w_ref[...],
                            preferred_element_type=jnp.float32)

    @pl.when(k == pl.num_programs(2) - 1)
    def _():
        y = acc_ref[...] + b_ref[...]
        if activation == "gelu":
            # TODO(synk): reference BERT may use the erf-form gelu; tanh
            # approximation (original TF BERT) differs at ~1e-3 level.
            y = 0.5 * y * (1.0 + jnp.tanh(0.7978845608028654 *
                                          (y + 0.044715 * y * y * y)))
        o_ref[...] = y.astype(o_ref.dtype)


def linear(x, w, b, activation="none", out_dtype=jnp.float32,
           tm=512, tn=512, tk=512):
    """x:[M,K] f32/bf16, w:[K,N] bf16, b:[1,N] f32 -> [M,N] (+bias, +opt gelu)."""
    M, K = x.shape
    N = w.shape[1]
    tm = _tile(M, tm, 8)
    tn = _tile(N, tn, 128)
    tk = _tile(K, tk, 128)
    grid = (M // tm, N // tn, K // tk)
    return pl.pallas_call(
        functools.partial(_linear_kernel, activation=activation),
        out_shape=jax.ShapeDtypeStruct((M, N), out_dtype),
        grid_spec=pltpu.PrefetchScalarGridSpec(
            num_scalar_prefetch=0,
            grid=grid,
            in_specs=[pl.BlockSpec((tm, tk), lambda i, j, k: (i, k)),
                      pl.BlockSpec((tk, tn), lambda i, j, k: (k, j)),
                      pl.BlockSpec((1, tn), lambda i, j, k: (0, j))],
            out_specs=pl.BlockSpec((tm, tn), lambda i, j, k: (i, j)),
            scratch_shapes=[pltpu.VMEM((tm, tn), jnp.float32)]),
        compiler_params=pltpu.CompilerParams(
            dimension_semantics=("parallel", "parallel", "arbitrary"),
            vmem_limit_bytes=VMEM_LIMIT),
    )(x, w, b)


# ------------- linear + bias + residual + LayerNorm (fused epilogue) -------------

def _linear_add_ln_kernel(x_ref, w_ref, b_ref, res_ref, g_ref, beta_ref,
                          o_ref, acc_ref):
    k = pl.program_id(1)

    @pl.when(k == 0)
    def _():
        acc_ref[...] = jnp.zeros_like(acc_ref)

    acc_ref[...] += jnp.dot(x_ref[...].astype(jnp.bfloat16),
                            w_ref[...],
                            preferred_element_type=jnp.float32)

    @pl.when(k == pl.num_programs(1) - 1)
    def _():
        h = acc_ref[...] + b_ref[...] + res_ref[...]
        mean = jnp.mean(h, axis=-1, keepdims=True)
        c = h - mean
        var = jnp.mean(c * c, axis=-1, keepdims=True)
        o_ref[...] = (c * lax.rsqrt(var + 1e-12) * g_ref[...]
                      + beta_ref[...]).astype(o_ref.dtype)


def linear_add_ln(x, w, b, res, gamma, beta, tm=512, tk=512):
    """LayerNorm(x @ w + b + res) over the full hidden (lane) axis.

    N (=H) is kept untiled so the LN reduction sees the full hidden axis
    while the matmul result is still in VMEM. tm capped at 512 to stay
    comfortably under v7x's 64 MiB VMEM with the full-H accumulator.
    """
    M, K = x.shape
    N = w.shape[1]
    tm = _tile(M, tm, 8)
    tk = _tile(K, tk, 128)
    grid = (M // tm, K // tk)
    return pl.pallas_call(
        _linear_add_ln_kernel,
        out_shape=jax.ShapeDtypeStruct((M, N), jnp.float32),
        grid_spec=pltpu.PrefetchScalarGridSpec(
            num_scalar_prefetch=0,
            grid=grid,
            in_specs=[pl.BlockSpec((tm, tk), lambda i, k: (i, k)),
                      pl.BlockSpec((tk, N), lambda i, k: (k, 0)),
                      pl.BlockSpec((1, N), lambda i, k: (0, 0)),
                      pl.BlockSpec((tm, N), lambda i, k: (i, 0)),
                      pl.BlockSpec((1, N), lambda i, k: (0, 0)),
                      pl.BlockSpec((1, N), lambda i, k: (0, 0))],
            out_specs=pl.BlockSpec((tm, N), lambda i, k: (i, 0)),
            scratch_shapes=[pltpu.VMEM((tm, N), jnp.float32)]),
        compiler_params=pltpu.CompilerParams(
            dimension_semantics=("parallel", "arbitrary"),
            vmem_limit_bytes=VMEM_LIMIT),
    )(x, w, b, res, gamma, beta)


# --------------- embeddings: fused (word + pos + tok) sum + LayerNorm ---------------

def _emb_ln_kernel(we_ref, pt_ref, g_ref, b_ref, o_ref):
    h = we_ref[0] + pt_ref[...]                     # [ts, H] f32
    mean = jnp.mean(h, axis=-1, keepdims=True)
    c = h - mean
    var = jnp.mean(c * c, axis=-1, keepdims=True)
    o_ref[0] = c * lax.rsqrt(var + 1e-12) * g_ref[...] + b_ref[...]


def embed_layer_norm(we, pe_te, gamma, beta, ts=256):
    """LayerNorm(word_emb + (pos_emb + tok_emb)) without an HBM round trip."""
    B, S, H = we.shape
    ts = _tile(S, ts, 8)
    return pl.pallas_call(
        _emb_ln_kernel,
        out_shape=jax.ShapeDtypeStruct((B, S, H), jnp.float32),
        grid_spec=pltpu.PrefetchScalarGridSpec(
            num_scalar_prefetch=0,
            grid=(B, S // ts),
            in_specs=[pl.BlockSpec((1, ts, H), lambda b, s: (b, s, 0)),
                      pl.BlockSpec((ts, H), lambda b, s: (s, 0)),
                      pl.BlockSpec((1, H), lambda b, s: (0, 0)),
                      pl.BlockSpec((1, H), lambda b, s: (0, 0))],
            out_specs=pl.BlockSpec((1, ts, H), lambda b, s: (b, s, 0))),
        compiler_params=pltpu.CompilerParams(
            dimension_semantics=("parallel", "parallel"),
            vmem_limit_bytes=VMEM_LIMIT),
    )(we, pe_te, gamma, beta)


# ----------------------------- multi-head attention -----------------------------

def _attn_kernel(qkv_ref, bias_ref, o_ref, *, num_heads, head_dim, group, tq):
    # qkv_ref: (1, S, 3H) bf16 slab, VMEM-resident across q tiles (block index
    #   constant per batch). bias_ref: (1, 1, S) additive -10000 padding mask.
    # o_ref: (1, tq, H) bf16, written in 128-lane head groups (unmasked stores).
    H = num_heads * head_dim
    row0 = pl.multiple_of(pl.program_id(1) * tq, tq)
    bias = bias_ref[0]                               # [1, S] f32

    for g0 in range(0, num_heads, group):
        lo = g0 * head_dim
        gw = group * head_dim
        # 128-lane (group-wide) loads of the Q rows for this tile and full K/V.
        q_g = qkv_ref[0, pl.ds(row0, tq), pl.ds(lo, gw)]            # [tq, gw]
        k_g = qkv_ref[0, :, pl.ds(H + lo, gw)]                      # [S,  gw]
        v_g = qkv_ref[0, :, pl.ds(2 * H + lo, gw)]                  # [S,  gw]
        outs = []
        for hh in range(group):
            a = hh * head_dim
            qh = q_g[:, a:a + head_dim]
            kh = k_g[:, a:a + head_dim]
            vh = v_g[:, a:a + head_dim]
            # scores: 1/sqrt(dH) already folded into the Q weights
            s = lax.dot_general(qh, kh, (((1,), (1,)), ((), ())),
                                preferred_element_type=jnp.float32)
            s = s + bias
            m = jnp.max(s, axis=-1, keepdims=True)
            p = jnp.exp(s - m)
            inv = pl.reciprocal(jnp.sum(p, axis=-1, keepdims=True), approx=True)
            oh = lax.dot_general(p.astype(jnp.bfloat16), vh,
                                 (((1,), (0,)), ((), ())),
                                 preferred_element_type=jnp.float32)
            outs.append(oh * inv)
        blk = outs[0] if group == 1 else jnp.concatenate(outs, axis=-1)
        o_ref[0, :, pl.ds(lo, gw)] = blk.astype(o_ref.dtype)


def mha_attention(qkv, bias, num_heads, head_dim, tq=256):
    # qkv: [B, S, 3H] bf16, bias: [B, 1, S] f32 -> [B, S, H] bf16
    B, S, threeH = qkv.shape
    H = num_heads * head_dim
    tq = _tile(S, tq, 8)
    if head_dim >= 128:
        group = 1
    else:
        group = min(num_heads, max(1, 128 // head_dim))
        while num_heads % group:
            group -= 1
    return pl.pallas_call(
        functools.partial(_attn_kernel, num_heads=num_heads,
                          head_dim=head_dim, group=group, tq=tq),
        out_shape=jax.ShapeDtypeStruct((B, S, H), jnp.bfloat16),
        grid_spec=pltpu.PrefetchScalarGridSpec(
            num_scalar_prefetch=0,
            grid=(B, S // tq),
            in_specs=[pl.BlockSpec((1, S, threeH), lambda b, q: (b, 0, 0)),
                      pl.BlockSpec((1, 1, S), lambda b, q: (b, 0, 0))],
            out_specs=pl.BlockSpec((1, tq, H), lambda b, q: (b, q, 0))),
        compiler_params=pltpu.CompilerParams(
            dimension_semantics=("parallel", "parallel"),
            vmem_limit_bytes=VMEM_LIMIT),
    )(qkv, bias)


# ----------------------------- parameter init -----------------------------

def init_params(key, cfg):
    H = cfg["hidden_size"]
    I = cfg["intermediate_size"]
    nH = cfg["num_heads"]
    dH = H // nH
    scale = 1.0 / math.sqrt(dH)
    std = 0.02

    def nrm(k, shape):
        return jax.random.normal(k, shape, jnp.float32) * std

    keys = iter(jax.random.split(key, 256))
    params = {
        "word_emb": nrm(next(keys), (cfg["vocab_size"], H)),
        "pos_emb": nrm(next(keys), (cfg["max_position"], H)),
        "tok_emb": nrm(next(keys), (cfg["type_vocab_size"], H)),
        "emb_ln_g": jnp.ones((1, H), jnp.float32),
        "emb_ln_b": jnp.zeros((1, H), jnp.float32),
        "layers": [],
        # fc head (declared in StageModel0.__init__, unused in forward):
        "fc_w": nrm(next(keys), (H, cfg["num_classes"])),
        "fc_b": jnp.zeros((1, cfg["num_classes"]), jnp.float32),
    }
    for _ in range(cfg["num_layers"]):
        wq = nrm(next(keys), (H, H))
        wk = nrm(next(keys), (H, H))
        wv = nrm(next(keys), (H, H))
        bq = jnp.zeros((1, H), jnp.float32)
        bk = jnp.zeros((1, H), jnp.float32)
        bv = jnp.zeros((1, H), jnp.float32)
        # fuse QKV into one [H, 3H] weight; fold 1/sqrt(dH) into the Q part
        wqkv = jnp.concatenate([wq * scale, wk, wv], axis=1)
        bqkv = jnp.concatenate([bq * scale, bk, bv], axis=1)
        lp = {
            "wqkv": wqkv.astype(jnp.bfloat16),
            "bqkv": bqkv,
            "wo": nrm(next(keys), (H, H)).astype(jnp.bfloat16),
            "bo": jnp.zeros((1, H), jnp.float32),
            "attn_ln_g": jnp.ones((1, H), jnp.float32),
            "attn_ln_b": jnp.zeros((1, H), jnp.float32),
            "wi": nrm(next(keys), (H, I)).astype(jnp.bfloat16),
            "bi": jnp.zeros((1, I), jnp.float32),
            "wo2": nrm(next(keys), (I, H)).astype(jnp.bfloat16),
            "bo2": jnp.zeros((1, H), jnp.float32),
            "out_ln_g": jnp.ones((1, H), jnp.float32),
            "out_ln_b": jnp.zeros((1, H), jnp.float32),
        }
        params["layers"].append(lp)
    return params


# ----------------------------- BERT forward -----------------------------

def bert_encoder_forward(params, context, mask, cfg):
    """PPBertModel(context, attention_mask=mask,
    output_all_encoded_layers=False) -> last-layer hidden states [B, S, H]."""
    B, S = context.shape
    H = cfg["hidden_size"]
    nH = cfg["num_heads"]
    dH = H // nH
    M = B * S

    # ---- embeddings: gather (plain-JAX glue) + fused sum/LayerNorm kernel ----
    we = jnp.take(params["word_emb"], context, axis=0)            # [B, S, H]
    pe_te = params["pos_emb"][:S] + params["tok_emb"][0][None, :]  # token_type_ids = 0
    h = embed_layer_norm(we, pe_te, params["emb_ln_g"], params["emb_ln_b"])
    h = h.reshape(M, H)                                           # f32 residual stream

    # ---- extended attention mask: (1 - mask) * -10000 ----
    bias = (1.0 - mask.astype(jnp.float32)) * -10000.0            # [B, S]
    bias = bias[:, None, :]                                       # [B, 1, S]

    for lp in params["layers"]:
        # fused QKV projection (scale already folded into Q weights), bf16 out
        qkv = linear(h, lp["wqkv"], lp["bqkv"], out_dtype=jnp.bfloat16)  # [M, 3H]
        ctx = mha_attention(qkv.reshape(B, S, 3 * H), bias,
                            num_heads=nH, head_dim=dH)            # [B, S, H] bf16
        # output projection + residual + LayerNorm (fused epilogue) -> f32
        h = linear_add_ln(ctx.reshape(M, H), lp["wo"], lp["bo"], h,
                          lp["attn_ln_g"], lp["attn_ln_b"])
        # feed-forward: intermediate gelu (bf16 out), then out-proj + residual + LN
        inter = linear(h, lp["wi"], lp["bi"], activation="gelu",
                       out_dtype=jnp.bfloat16)                    # [M, I]
        h = linear_add_ln(inter, lp["wo2"], lp["bo2"], h,
                          lp["out_ln_g"], lp["out_ln_b"])

    return h.reshape(B, S, H)


def stage_model0_forward(params, x, cfg):
    context, mask = x[0], x[2]        # x[1] (seq_len) is unused, as in PyTorch
    encoded_layers = bert_encoder_forward(params, context, mask, cfg)
    return encoded_layers


# ----------------------------- main -----------------------------

if __name__ == "__main__":
    cfg = dict(
        vocab_size=100,
        hidden_size=32,
        num_layers=2,
        num_heads=4,
        intermediate_size=64,
        max_position=32,
        type_vocab_size=2,
        num_classes=2,
    )
    B, S = 2, 8

    key = jax.random.PRNGKey(0)
    k_param, k_ctx = jax.random.split(key)
    params = init_params(k_param, cfg)

    context = jax.random.randint(k_ctx, (B, S), 0, cfg["vocab_size"],
                                 dtype=jnp.int32)
    seq_len = jnp.full((B,), S, dtype=jnp.int32)
    mask = jnp.ones((B, S), jnp.int32).at[1, 6:].set(0)   # pad last 2 of batch 1
    x = (context, seq_len, mask)

    out = stage_model0_forward(params, x, cfg)
    out = jax.block_until_ready(out)
    assert out.shape == (B, S, cfg["hidden_size"])
    assert jnp.all(jnp.isfinite(out))
    print("KERNEL_OK")
</pallas_src>

<mosaic_0001>
module attributes {stable_mosaic.version = 11 : i64} {
  func.func @_emb_ln_kernel(%arg0: i32, %arg1: i32, %arg2: memref<1x8x32xf32, #tpu.memory_space<vmem>>, %arg3: memref<8x32xf32, #tpu.memory_space<vmem>>, %arg4: memref<1x32xf32, #tpu.memory_space<vmem>>, %arg5: memref<1x32xf32, #tpu.memory_space<vmem>>, %arg6: memref<1x8x32xf32, #tpu.memory_space<vmem>>) attributes {dimension_semantics = [#tpu.dimension_semantics<parallel>, #tpu.dimension_semantics<parallel>], iteration_bounds = array<i64: 2, 1>, scalar_prefetch = 0 : i64, scratch_operands = 0 : i64, tpu.core_type = #tpu.core_type<tc>, window_params = [{transform_indices = @transform_0, window_bounds = array<i64: 1, 8, 32>}, {transform_indices = @transform_1, window_bounds = array<i64: 8, 32>}, {pipeline_mode = #tpu.pipeline_mode<synchronous>, transform_indices = @transform_2, window_bounds = array<i64: 1, 32>}, {pipeline_mode = #tpu.pipeline_mode<synchronous>, transform_indices = @transform_3, window_bounds = array<i64: 1, 32>}, {transform_indices = @transform_4, window_bounds = array<i64: 1, 8, 32>}]} {
    %c0 = arith.constant 0 : index
    %c0_0 = arith.constant 0 : index
    %c0_1 = arith.constant 0 : index
    %0 = vector.load %arg2[%c0, %c0_0, %c0_1] : memref<1x8x32xf32, #tpu.memory_space<vmem>>, vector<1x8x32xf32>
    %1 = vector.shape_cast %0 : vector<1x8x32xf32> to vector<8x32xf32>
    %c0_2 = arith.constant 0 : index
    %c0_3 = arith.constant 0 : index
    %2 = vector.load %arg3[%c0_2, %c0_3] : memref<8x32xf32, #tpu.memory_space<vmem>>, vector<8x32xf32>
    %3 = arith.addf %1, %2 : vector<8x32xf32>
    %cst = arith.constant dense<0.000000e+00> : vector<8xf32>
    %4 = vector.multi_reduction <add>, %3, %cst [1] : vector<8x32xf32> to vector<8xf32>
    %5 = vector.shape_cast %4 : vector<8xf32> to vector<8x1xf32>
    %cst_4 = arith.constant 3.200000e+01 : f32
    %6 = vector.broadcast %cst_4 : f32 to vector<8x1xf32>
    %7 = arith.divf %5, %6 : vector<8x1xf32>
    %8 = vector.broadcast %7 : vector<8x1xf32> to vector<8x32xf32>
    %9 = arith.subf %3, %8 : vector<8x32xf32>
    %10 = arith.mulf %9, %9 : vector<8x32xf32>
    %cst_5 = arith.constant dense<0.000000e+00> : vector<8xf32>
    %11 = vector.multi_reduction <add>, %10, %cst_5 [1] : vector<8x32xf32> to vector<8xf32>
    %12 = vector.shape_cast %11 : vector<8xf32> to vector<8x1xf32>
    %cst_6 = arith.constant 3.200000e+01 : f32
    %13 = vector.broadcast %cst_6 : f32 to vector<8x1xf32>
    %14 = arith.divf %12, %13 : vector<8x1xf32>
    %cst_7 = arith.constant 9.99999996E-13 : f32
    %15 = vector.broadcast %cst_7 : f32 to vector<8x1xf32>
    %16 = arith.addf %14, %15 : vector<8x1xf32>
    %17 = math.rsqrt %16 : vector<8x1xf32>
    %18 = vector.broadcast %17 : vector<8x1xf32> to vector<8x32xf32>
    %19 = arith.mulf %9, %18 : vector<8x32xf32>
    %c0_8 = arith.constant 0 : index
    %c0_9 = arith.constant 0 : index
    %20 = vector.load %arg4[%c0_8, %c0_9] : memref<1x32xf32, #tpu.memory_space<vmem>>, vector<1x32xf32>
    %21 = vector.broadcast %20 : vector<1x32xf32> to vector<8x32xf32>
    %22 = arith.mulf %19, %21 : vector<8x32xf32>
    %c0_10 = arith.constant 0 : index
    %c0_11 = arith.constant 0 : index
    %23 = vector.load %arg5[%c0_10, %c0_11] : memref<1x32xf32, #tpu.memory_space<vmem>>, vector<1x32xf32>
    %24 = vector.broadcast %23 : vector<1x32xf32> to vector<8x32xf32>
    %25 = arith.addf %22, %24 : vector<8x32xf32>
    %c0_12 = arith.constant 0 : index
    %c0_13 = arith.constant 0 : index
    %c0_14 = arith.constant 0 : index
    %26 = vector.load %arg6[%c0_12, %c0_13, %c0_14] : memref<1x8x32xf32, #tpu.memory_space<vmem>>, vector<1x8x32xf32>
    %27 = vector.shape_cast %26 : vector<1x8x32xf32> to vector<8x32xf32>
    %28 = vector.shape_cast %25 : vector<8x32xf32> to vector<1x8x32xf32>
    tpu.vector_store %arg6[%c0_12, %c0_13, %c0_14], %28 {strides = array<i32>} : memref<1x8x32xf32, #tpu.memory_space<vmem>>, vector<1x8x32xf32>,
    return
  }
  func.func @transform_0(%arg0: i32, %arg1: i32) -> (i32, i32, i32) {
    %c0_i32 = arith.constant 0 : i32
    %c0_i32_0 = arith.constant 0 : i32
    return %arg0, %arg1, %c0_i32 : i32, i32, i32
  }
  func.func @transform_1(%arg0: i32, %arg1: i32) -> (i32, i32) {
    %c0_i32 = arith.constant 0 : i32
    %c0_i32_0 = arith.constant 0 : i32
    return %arg1, %c0_i32 : i32, i32
  }
  func.func @transform_2(%arg0: i32, %arg1: i32) -> (i32, i32) {
    %c0_i32 = arith.constant 0 : i32
    %c0_i32_0 = arith.constant 0 : i32
    %c0_i32_1 = arith.constant 0 : i32
    return %c0_i32, %c0_i32_0 : i32, i32
  }
  func.func @transform_3(%arg0: i32, %arg1: i32) -> (i32, i32) {
    %c0_i32 = arith.constant 0 : i32
    %c0_i32_0 = arith.constant 0 : i32
    %c0_i32_1 = arith.constant 0 : i32
    return %c0_i32, %c0_i32_0 : i32, i32
  }
  func.func @transform_4(%arg0: i32, %arg1: i32) -> (i32, i32, i32) {
    %c0_i32 = arith.constant 0 : i32
    %c0_i32_0 = arith.constant 0 : i32
    return %arg0, %arg1, %c0_i32 : i32, i32, i32
  }
}

</mosaic_0001>

<bundles_post_ra>
// kernel: tpu_custom_call.1
= control target key start
LH: loop header
LB: loop body
LE: loop exit
PB: predicated region body
PF: predicated region fallthrough
CT: control target
= control target key end

     0   :  { %9 = vsyncpa [#allocation3], 0  ;;  %s839_s0 = inlined_call_operand.hbm [shape: f32[2,8,32], index: 0, kind: input, shape index: {}]   ;;  %s840_s1 = inlined_call_operand.hbm [shape: f32[8,32], index: 1, kind: input, shape index: {}]   ;;  %s841_s2 = inlined_call_operand.vmem [shape: f32[1,32], index: 2, kind: input, shape index: {}]   ;;  %s842_s3 = inlined_call_operand.vmem [shape: f32[1,32], index: 3, kind: input, shape index: {}]   ;;  %s843_s4 = inlined_call_operand.hbm [shape: f32[2,8,32], index: 4, kind: output, shape index: {}]  }
   0x1   :  { %11 = vsyncpa [#allocation3 + $0x1], 0 }
   0x2   :  { %12 = vsyncpa [#allocation6], 0 }
   0x3   :  { %13 = vsyncpa [#allocation4], 0 }
   0x4   :  { %15 = vsyncpa [#allocation4 + $0x1], 0  ;;  %s677_s15 = smov 0   ;;  %s679_s16 = smov 0  }
   0x5   :  { %s681_s17 = smov 0   ;;  %s683_s18 = smov 0  }
   0x6   :  { %s685_s19 = smov 0   ;;  %s687_s20 = smov 0  }
   0x7 LB: > { %s407_s21 = sadd.s32 4294967295, %s648_s20   ;;  %s408_s22 = sadd.s32 4294967294, %s648_s20   ;;  %s648_s20 = sphi %s687_s20, %s21_s20   ;;  %s644_s19 = sphi %s685_s19, %s855_s19   ;;  %s640_s18 = sphi %s683_s18, %s854_s18   ;;  %s636_s17 = sphi %s681_s17, %s853_s17   ;;  %s632_s16 = sphi %s679_s16, %s852_s16   ;;  %s628_s15 = sphi %s677_s15, %s851_s15  }
   0x8   : > { %p55_p0 = scmp.ne.s32.totalorder %s632_s16, %s628_s15  ;;  %p711_p1 = scmp.eq.s32.totalorder %s407_s21, 0 }
   0x9   : > { %p715_p2 = scmp.eq.s32.totalorder %s407_s21, 1  ;;  %p155_p3 = scmp.eq.s32.totalorder %s408_s22, 1 }
   0xa   : > { %p721_p4 = por %p711_p1, %p55_p0  ;;  %p409_p5 = scmp.ge.s32.totalorder %s648_s20, 1 }
   0xb   : > { %p726_p6 = por %p155_p3, %p55_p0  ;;  %p162_p7 = scmp.lt.s32.totalorder %s648_s20, 3 }
   0xc   : > { %s176_s29 = sshll.u32 %s840_s1, 4  ;;  %p411_p9 = scmp.ge.s32.totalorder %s648_s20, 2  ;;  %s177_s29 = int_to_ptr.hbm [resolvable:$true] %s176_s29 }
   0xd   : > { %p734_p8 = pnand %p409_p5, %p162_p7  ;;  %s650_s5 = smov [#allocation5]  }
   0xe   : > { %s178_s6 = sshll.u32 %s650_s5, 4  ;;  %s33_s7 = sadd.s32 1, %s644_s19  ;;  %s179_s6 = int_to_ptr.vmem [resolvable:$true] %s178_s6 }
   0xf   : > { %p430_p10 = pneg %p734_p8  ;;  %p35_p12 = scmp.ge.s32.totalorder %s33_s7, 2 }
  0x10   : > { %s42_s8 = sadd.s32 1, %s636_s17  ;;  %p49_p13 = scmp.ne.s32.totalorder %s636_s17, %s632_s16 }
  0x11   : > { %p431_p11 = pnand %p430_p10, %p711_p1  ;;  %p50_p0 = scmp.eq.s32.totalorder %s648_s20, 0 }
  0x12   : > { %s857_s7 = smov (%p35_p12, %s33_s7), 0  ;;  %p756_p5 = por %p715_p2, %p49_p13 }
  0x13   : > { %433 = dma.hbm_to_vmem [thread:$0]  (!%p431_p11), %s177_s29, 128, %s179_s6, [#allocation6]  }
  0x14   : > { %p750_p3 = por %p50_p0, %p49_p13  ;;  %s37_s11 = ssub.s32 %s644_s19, %s857_s7 }
  0x15   : > { %p443_p7 = scmp.lt.s32.totalorder %s648_s20, 2  ;;  %p40_p10 = scmp.eq.s32.totalorder %s37_s11, 0 }
  0x16   : > { %s195_s12 = sand.u32 1, %s636_s17   ;;  %s413_s21 = sshll.u32 %s644_s19, 3 }
  0x17   : > { %s412_s13 = sshll.u32 %s195_s12, 3  ;;  %s204_s28 = scalar_lea.hbm %s839_s0, %s413_s21 }
  0x18   : > { %s765_s14 = scalar_select %p40_p10, %s636_s17, %s42_s8  }
  0x19   : > { %s199_s29 = scalar_lea.vmem [#allocation2], %s412_s13  ;;  %s206_s24 = sshll.u32 %s204_s28, 4  ;;  %s207_s24 = int_to_ptr.hbm [resolvable:$true] %s206_s24 }
  0x1a   : > { %s208_s5 = sshll.u32 %s199_s29, 4  ;;  %p435_p2 = pnand %p443_p7, %p750_p3  ;;  %s209_s5 = int_to_ptr.vmem [resolvable:$true] %s208_s5 }
  0x1b   : > { %s196_s6 = scalar_lea.sflag [#allocation3], %s195_s12  ;;  %217 = sbr.rel (%p734_p8) target bundleno = 309 (0x135), region = 36 }
  0x1c   : > { %437 = dma.hbm_to_vmem [thread:$0]  (!%p435_p2), %s207_s24, 128, %s209_s5, %s196_s6  }
  0x1d   : > { %s776_s8 = sand.u32 (!%p734_p8), 1, %s632_s16  }
  0x1e   : > { %s415_s11 = sshll.u32 (!%p734_p8), %s776_s8, 3  ;;  %s220_s13 = scalar_lea.sflag (!%p734_p8), [#allocation3], %s776_s8 }
  0x1f   : > { %s223_s21 = scalar_lea.vmem (!%p734_p8), [#allocation2], %s415_s11 }
  0x20   : > { %615 = dma.done.wait (%p721_p4), %s220_s13, 128  }
  0x21   : > { %617 = vsyncadd (%p721_p4), %s220_s13, 4294967168 }
  0x22   : > { %619 = dma.done.wait (%p711_p1), [#allocation6], 128  }
  0x23   : > { %621 = vsyncadd (%p711_p1), [#allocation6], 4294967168  ;;  %v254_v0 = vld [vmem:[%s223_s21] sm:$0xff]  ;;  %v255_v1 = vld [vmem:[#allocation5] sm:$0xff]  ;;  %vm257_vm0 = vcmask 261120   ;;  %v651_v4 = vmov 32.0  }
  0x24   : > { %v256_v2 = vadd.f32 %v255_v1, %v254_v0  ;;  %498 = vrcp.f32 %v651_v4  ;;  %s419_s23 = sshll.u32 %s640_s18, 3  ;;  %v496_v25 = vld [vmem:[%s841_s2] ss:$0 sm:$0xff]  ;;  %s253_s18 = scalar_lea.vmem [#allocation7], %s415_s11 }
  0x25   : > { %s310_s22 = scalar_lea.hbm %s843_s4, %s419_s23  ;;  %v497_v28 = vld [vmem:[%s842_s3] ss:$0 sm:$0xff]  ;;  %s312_s29 = sshll.u32 %s253_s18, 4  ;;  %s313_s29 = int_to_ptr.vmem [resolvable:$true] %s312_s29 }
  0x26   : > { %v258_v3 = vsel %vm257_vm0, %v256_v2, 0.0  ;;  %s314_s5 = sshll.u32 %s310_s22, 4  ;;  %s299_s24 = scalar_lea.sflag [#allocation4], %s776_s8  ;;  %s315_s5 = int_to_ptr.hbm [resolvable:$true] %s314_s5 }
  0x27   : > { %259 = vadd.xlane.f32.xlu0 %v258_v3  ;;  %s576_s6 = sshra.s32 %s315_s5, 4  ;;  %s582_s11 = scalar_lea.hbm %s843_s4, 16  ;;  %s577_s6 = int_to_ptr.hbm [resolvable:$true] %s576_s6 }
  0x28   : > { %s578_s13 = scalar_lea.hbm %s577_s6, 8  ;;  %p583_p11 = scmp.lt.s32.totalorder %s577_s6, %s843_s4 }
  0x29   : > { %p579_p1 = scmp.ne.s32.totalorder %s577_s6, %s578_s13  ;;  %p584_p12 = scmp.lt.s32.totalorder %s582_s11, %s578_s13 }
  0x2a   : > { %v499_v5 = vpop.eup %498 }
  0x2b   : > { %v262_v6 = vmul.f32 32.0, %v499_v5  ;;  %vm266_vm1 = vweird.f32 %v499_v5  ;;  %p580_p4 = pnand %p579_p1, %p756_p5  ;;  %p585_p13 = por %p584_p12, %p583_p11 }
  0x2d   : > { %v263_v7 = vsub.f32 1.0, %v262_v6  ;;  %p581_p8 = pneg %p580_p4 }
  0x2f   : > { %v264_v8 = vmul.f32 %v499_v5, %v263_v7  ;;  %p586_p0 = pnand %p585_p13, %p581_p8 }
  0x31   : > { %v265_v9 = vadd.f32 %v499_v5, %v264_v8 }
  0x33   : > { %v267_v10 = vsel %vm266_vm1, %v499_v5, %v265_v9 }
  0x9a   : > { %v260_v11 = vpop.xlane.xlu0 %259 }
  0x9b   : > { %v268_v12 = vmul.f32 %v267_v10, %v260_v11 }
  0x9d   : > { %v269_v13 = vsub.f32 %v256_v2, %v268_v12 }
  0x9f   : > { %v270_v14 = vmul.f32 %v269_v13, %v269_v13 }
  0xa1   : > { %v271_v15 = vsel %vm257_vm0, %v270_v14, 0.0 }
  0xa2   : > { %272 = vadd.xlane.f32.xlu0 %v271_v15 }
 0x115   : > { %v273_v16 = vpop.xlane.xlu0 %272 }
 0x116   : > { %v274_v17 = vmul.f32 %v273_v16, %v267_v10 }
 0x118   : > { %v275_v18 = vadd.f32 1e-12, %v274_v17 }
 0x11a   : > { %500 = vrsqrt.f32 %v275_v18  ;;  %vm282_vm3 = vweird.f32 %v275_v18 }
 0x120   : > { %v501_v19 = vpop.eup %500 }
 0x121   : > { %v277_v20 = vmul.f32 %v501_v19, %v275_v18  ;;  %vm283_vm2 = vweird.f32 %v501_v19 }
 0x122   : > { %vm284_vm4 = vmor %vm282_vm3, %vm283_vm2 }
 0x123   : > { %v278_v21 = vmul.f32 %v501_v19, %v277_v20 }
 0x125   : > { %v279_v22 = vmul.f32 0.5, %v278_v21 }
 0x127   : > { %v280_v23 = vsub.f32 1.5, %v279_v22 }
 0x129   : > { %v281_v24 = vmul.f32 %v501_v19, %v280_v23 }
 0x12b   : > { %v285_v26 = vsel %vm284_vm4, %v501_v19, %v281_v24 }
 0x12c   : > { %v286_v27 = vmul.f32 %v285_v26, %v269_v13 }
 0x12e   : > { %v291_v29 = vmul.f32 %v496_v25, %v286_v27 }
 0x130   : > { %v296_v30 = vadd.f32 %v497_v28, %v291_v29 }
 0x132   : > { %297 = vst.msk [vmem:[%s253_s18] sm:$0xff] %vm257_vm0, %v296_v30 }
 0x133   : > { %589 = shalt.err (!%p586_p0)
}
 0x134   : > { %428 = dma.vmem_to_hbm [thread:$0]  (%p756_p5), %s313_s29, 128, %s315_s5, %s299_s24  }
 0x135 PF: > { %s326_s8 = sand.u32 1, %s628_s15   ;;  %p439_p3 = pnand %p411_p9, %p726_p6 }
 0x136   : > { %s327_s9 = scalar_lea.sflag [#allocation4], %s326_s8 }
 0x137   : > { %p440_p7 = pneg %p439_p3 }
 0x139   : > { %623 = dma.done.wait (%p440_p7), %s327_s9, 128  }
 0x13a   : > { %625 = vsyncadd (%p440_p7), %s327_s9, 4294967168  ;;  %s21_s20 = sadd.s32 1, %s648_s20   ;;  %s851_s15 = smov %s632_s16 }
 0x13b   : > { %p18_p10 = scmp.ge.s32.totalorder %s21_s20, 4   ;;  %s852_s16 = smov %s636_s17 }
 0x13c   : > { %s853_s17 = smov %s765_s14  ;;  %s854_s18 = smov %s644_s19 }
 0x13d   : > { %s855_s19 = smov %s857_s7  ;;  %20 = sbr.rel (!%p18_p10) target bundleno = 7 (0x7), region = 86 }
 0x142   :  { %333 = vsyncpa [#allocation3], 1 }
 0x143   :  { %335 = vsyncpa [#allocation3 + $0x1], 1 }
 0x144   :  { %336 = vsyncpa [#allocation6], 1 }
 0x145   :  { %337 = vsyncpa [#allocation4], 1 }
 0x146   :  { %339 = vsyncpa [#allocation4 + $0x1], 1 }

</bundles_post_ra>
